<compile_context>
chip_gen: v5e
topology: v5e:2x2
jax: 0.10.0
libtpu: 0.0.40
codegen_flags: <defaults>
</compile_context>

<pallas_src>
import functools

import jax
import jax.numpy as jnp
from jax import lax
from jax.experimental import pallas as pl
from jax.experimental.pallas import tpu as pltpu


# ----------------------------------------------------------------------------
# In-kernel helpers
# ----------------------------------------------------------------------------
def _shift_lanes(v, s):
    """tap[:, i] = v[:, i + s]; positions whose flat source falls outside [0, L)
    are zero-filled (out-of-row wraps are killed by the validity mask)."""
    c, n = v.shape
    if s == 0:
        return v
    z = jnp.zeros((c, abs(s)), v.dtype)
    if s > 0:
        return jnp.concatenate([v[:, s:], z], axis=1)
    return jnp.concatenate([z, v[:, :n + s]], axis=1)


def _dw3x3_flat(h, wd_ref, bd_ref, mask_ref, W):
    """3x3 depthwise conv (pad=1, stride=1) + folded-BN bias on a (C, H*W) tile.

    h: (C, HW) f32 value; wd_ref: (C, 9); bd_ref: (C, 1); mask_ref: (9, HW)
    validity mask (1.0 where the tap's source pixel is inside the image).
    """
    C, HW = h.shape
    acc = bd_ref[...] + jnp.zeros((C, HW), jnp.float32)
    for kh in range(3):
        for kw in range(3):
            k = kh * 3 + kw
            tap = _shift_lanes(h, (kh - 1) * W + (kw - 1))
            acc = acc + (tap * mask_ref[k:k + 1, :]) * wd_ref[:, k:k + 1]
    return acc


# ----------------------------------------------------------------------------
# Fused whole-block kernels (one image per grid step)
# ----------------------------------------------------------------------------
def _block_s1_kernel(x_ref, mask_ref, w1_ref, b1_ref, wd_ref, bd_ref,
                     w2_ref, b2_ref, wl_ref, o_ref, *, W):
    c_in = x_ref.shape[1]
    bf = c_in // 2
    x = x_ref[0]                       # (2*bf, HW), lane dim = HW
    x1 = x[:bf, :]                     # shortcut half (passes through untouched)
    x2 = x[bf:, :]                     # branch-2 input half
    # 1x1 conv + BN + ReLU
    h = jnp.dot(w1_ref[...], x2, preferred_element_type=jnp.float32) + b1_ref[...]
    h = jnp.maximum(h, 0.0)
    # 3x3 depthwise conv + BN
    d = _dw3x3_flat(h, wd_ref, bd_ref, mask_ref, W)
    # 1x1 conv + BN + ReLU, weights pre-expanded to interleaved (odd) out channels
    y = jnp.dot(w2_ref[...], d, preferred_element_type=jnp.float32) + b2_ref[...]
    y = jnp.maximum(y, 0.0)
    # shortcut half into the even out channels (wl is a 0/1 interleave matrix)
    y = y + jnp.dot(wl_ref[...], x1, preferred_element_type=jnp.float32)
    o_ref[0] = y.astype(o_ref.dtype)


def _block_s2_kernel(x_ref, mask_ref, sel_ref,
                     wd1_ref, bd1_ref, wp1_ref, bp1_ref,
                     w21_ref, b21_ref, wd2_ref, bd2_ref, w22_ref, b22_ref,
                     o_ref, *, W):
    x = x_ref[0]                        # (Cin, HW)
    sel = sel_ref[...]                  # (HW, HWo) 0/1 stride-2 selection
    # branch1: dw3x3(stride 2) + BN  ->  1x1 + BN + ReLU   (even out channels)
    d1 = _dw3x3_flat(x, wd1_ref, bd1_ref, mask_ref, W)
    d1 = jnp.dot(d1, sel, preferred_element_type=jnp.float32)
    y1 = jnp.dot(wp1_ref[...], d1, preferred_element_type=jnp.float32) + bp1_ref[...]
    y1 = jnp.maximum(y1, 0.0)
    # branch2: 1x1 + BN + ReLU -> dw3x3(stride 2) + BN -> 1x1 + BN + ReLU  (odd)
    h = jnp.dot(w21_ref[...], x, preferred_element_type=jnp.float32) + b21_ref[...]
    h = jnp.maximum(h, 0.0)
    d2 = _dw3x3_flat(h, wd2_ref, bd2_ref, mask_ref, W)
    d2 = jnp.dot(d2, sel, preferred_element_type=jnp.float32)
    y2 = jnp.dot(w22_ref[...], d2, preferred_element_type=jnp.float32) + b22_ref[...]
    y2 = jnp.maximum(y2, 0.0)
    o_ref[0] = (y1 + y2).astype(o_ref.dtype)


# ----------------------------------------------------------------------------
# pallas_call wrappers
# ----------------------------------------------------------------------------
def _wspec(a):
    return pl.BlockSpec(a.shape, lambda n: (0, 0))


def _fused_block_s1(x_flat, dwmask, w1, b1, wd, bd, w2e, b2e, wl, H, W):
    N, C, HW = x_flat.shape
    return pl.pallas_call(
        functools.partial(_block_s1_kernel, W=W),
        out_shape=jax.ShapeDtypeStruct((N, C, HW), x_flat.dtype),
        grid_spec=pltpu.PrefetchScalarGridSpec(
            num_scalar_prefetch=0,
            grid=(N,),
            in_specs=[
                pl.BlockSpec((1, C, HW), lambda n: (n, 0, 0)),
                _wspec(dwmask), _wspec(w1), _wspec(b1), _wspec(wd), _wspec(bd),
                _wspec(w2e), _wspec(b2e), _wspec(wl),
            ],
            out_specs=pl.BlockSpec((1, C, HW), lambda n: (n, 0, 0)),
        ),
        compiler_params=pltpu.CompilerParams(dimension_semantics=("parallel",)),
    )(x_flat, dwmask, w1, b1, wd, bd, w2e, b2e, wl)


def _fused_block_s2(x_flat, dwmask, sel, wd1, bd1, wp1e, bp1e,
                    w21, b21, wd2, bd2, w22e, b22e, H, W):
    N, Cin, HW = x_flat.shape
    Cout = wp1e.shape[0]          # = 2 * branch_features
    HWo = sel.shape[1]
    return pl.pallas_call(
        functools.partial(_block_s2_kernel, W=W),
        out_shape=jax.ShapeDtypeStruct((N, Cout, HWo), x_flat.dtype),
        grid_spec=pltpu.PrefetchScalarGridSpec(
            num_scalar_prefetch=0,
            grid=(N,),
            in_specs=[
                pl.BlockSpec((1, Cin, HW), lambda n: (n, 0, 0)),
                _wspec(dwmask), _wspec(sel),
                _wspec(wd1), _wspec(bd1), _wspec(wp1e), _wspec(bp1e),
                _wspec(w21), _wspec(b21), _wspec(wd2), _wspec(bd2),
                _wspec(w22e), _wspec(b22e),
            ],
            out_specs=pl.BlockSpec((1, Cout, HWo), lambda n: (n, 0, 0)),
        ),
        compiler_params=pltpu.CompilerParams(dimension_semantics=("parallel",)),
    )(x_flat, dwmask, sel, wd1, bd1, wp1e, bp1e, w21, b21, wd2, bd2, w22e, b22e)


# ----------------------------------------------------------------------------
# Host-side constant builders
# ----------------------------------------------------------------------------
def _dw_valid_mask(H, W):
    """(9, H*W) mask: 1.0 where tap (kh, kw) reads an in-bounds pixel."""
    hh, ww = jnp.meshgrid(jnp.arange(H), jnp.arange(W), indexing="ij")
    hh, ww = hh.reshape(-1), ww.reshape(-1)
    rows = []
    for kh in range(3):
        for kw in range(3):
            dh, dw = kh - 1, kw - 1
            rows.append(((hh + dh >= 0) & (hh + dh < H) &
                         (ww + dw >= 0) & (ww + dw < W)).astype(jnp.float32))
    return jnp.stack(rows, axis=0)


def _stride2_select(H, W):
    """(H*W, Ho*Wo) 0/1 matrix: right-multiply picks even rows/cols."""
    Ho, Wo = (H - 1) // 2 + 1, (W - 1) // 2 + 1
    src = (2 * jnp.arange(Ho)[:, None] * W + 2 * jnp.arange(Wo)[None, :]).reshape(-1)
    return jax.nn.one_hot(src, H * W, dtype=jnp.float32).T, Ho, Wo


def _interleave_mats(bf):
    eye = jnp.eye(bf, dtype=jnp.float32)
    p_left = jnp.zeros((2 * bf, bf), jnp.float32).at[0::2, :].set(eye)
    p_right = jnp.zeros((2 * bf, bf), jnp.float32).at[1::2, :].set(eye)
    return p_left, p_right


# ----------------------------------------------------------------------------
# Parameter init (deterministic), eval-mode BatchNorm folded into the convs
# ----------------------------------------------------------------------------
def _bn_fold(key, c, eps=1e-5):
    kg, kb, km, kv = jax.random.split(key, 4)
    gamma = jax.random.uniform(kg, (c,), jnp.float32, 0.5, 1.5)
    beta = jax.random.normal(kb, (c,), jnp.float32) * 0.1
    mean = jax.random.normal(km, (c,), jnp.float32) * 0.1
    var = jax.random.uniform(kv, (c,), jnp.float32, 0.5, 1.5)
    scale = gamma / jnp.sqrt(var + eps)
    return scale, beta - mean * scale


def init_params(key, input_c, output_c, stride):
    if stride not in (1, 2):
        raise ValueError("illegal stride value.")
    assert output_c % 2 == 0
    bf = output_c // 2
    assert stride != 1 or input_c == (bf << 1)

    keys = iter(jax.random.split(key, 16))

    def conv1x1(cin, cout):
        w = jax.random.normal(next(keys), (cout, cin), jnp.float32) * 0.1
        scale, bias = _bn_fold(next(keys), cout)
        return w * scale[:, None], bias

    def dw3x3(c):
        w = jax.random.normal(next(keys), (c, 3, 3), jnp.float32) * 0.1
        scale, bias = _bn_fold(next(keys), c)
        return (w * scale[:, None, None]).reshape(c, 9), bias

    p = {"stride": stride, "bf": bf}
    if stride == 2:
        p["b1_dw_w"], p["b1_dw_b"] = dw3x3(input_c)
        p["b1_pw_w"], p["b1_pw_b"] = conv1x1(input_c, bf)
    cin2 = input_c if stride > 1 else bf
    p["b2_pw1_w"], p["b2_pw1_b"] = conv1x1(cin2, bf)
    p["b2_dw_w"], p["b2_dw_b"] = dw3x3(bf)
    p["b2_pw2_w"], p["b2_pw2_b"] = conv1x1(bf, bf)
    return p


# ----------------------------------------------------------------------------
# Forward pass (matches InvertedResidual.forward; NCHW in / NCHW out)
# ----------------------------------------------------------------------------
def inverted_residual(params, x_nchw):
    stride, bf = params["stride"], params["bf"]
    N, C, H, W = x_nchw.shape
    HW = H * W
    x_flat = x_nchw.reshape(N, C, HW)          # free reshape, NCHW preserved
    dwmask = _dw_valid_mask(H, W)
    p_left, p_right = _interleave_mats(bf)

    col = lambda v: v.reshape(-1, 1)

    if stride == 1:
        # fold channel_shuffle(groups=2) into the last 1x1 of branch2 (odd rows)
        w2e = p_right @ params["b2_pw2_w"]
        b2e = col(p_right @ params["b2_pw2_b"])
        out = _fused_block_s1(
            x_flat, dwmask,
            params["b2_pw1_w"], col(params["b2_pw1_b"]),
            params["b2_dw_w"], col(params["b2_dw_b"]),
            w2e, b2e, p_left, H, W)
        return out.reshape(N, 2 * bf, H, W)

    sel, Ho, Wo = _stride2_select(H, W)
    # branch1's 1x1 -> even output rows, branch2's last 1x1 -> odd output rows
    wp1e = p_left @ params["b1_pw_w"]
    bp1e = col(p_left @ params["b1_pw_b"])
    w22e = p_right @ params["b2_pw2_w"]
    b22e = col(p_right @ params["b2_pw2_b"])
    out = _fused_block_s2(
        x_flat, dwmask, sel,
        params["b1_dw_w"], col(params["b1_dw_b"]), wp1e, bp1e,
        params["b2_pw1_w"], col(params["b2_pw1_b"]),
        params["b2_dw_w"], col(params["b2_dw_b"]),
        w22e, b22e, H, W)
    return out.reshape(N, 2 * bf, Ho, Wo)


# ----------------------------------------------------------------------------
# Pure-JAX reference (same folded params) mirroring the PyTorch module
# ----------------------------------------------------------------------------
def _ref_conv1x1(x, w, b, relu=True):
    y = jnp.einsum("oc,nchw->nohw", w, x) + b[None, :, None, None]
    return jnp.maximum(y, 0.0) if relu else y


def _ref_dw3x3(x, w9, b, stride):
    C = x.shape[1]
    w_oihw = w9.reshape(C, 3, 3)[:, None, :, :]
    y = lax.conv_general_dilated(
        x, w_oihw, window_strides=(stride, stride), padding=((1, 1), (1, 1)),
        dimension_numbers=("NCHW", "OIHW", "NCHW"), feature_group_count=C)
    return y + b[None, :, None, None]


def _ref_channel_shuffle(x, groups):
    N, C, H, W = x.shape
    return (x.reshape(N, groups, C // groups, H, W)
             .transpose(0, 2, 1, 3, 4).reshape(N, C, H, W))


def _ref_forward(params, x):
    stride, bf = params["stride"], params["bf"]
    if stride == 1:
        x1, x2 = x[:, :bf], x[:, bf:]
        b2 = _ref_conv1x1(x2, params["b2_pw1_w"], params["b2_pw1_b"])
        b2 = _ref_dw3x3(b2, params["b2_dw_w"], params["b2_dw_b"], 1)
        b2 = _ref_conv1x1(b2, params["b2_pw2_w"], params["b2_pw2_b"])
        out = jnp.concatenate([x1, b2], axis=1)
    else:
        b1 = _ref_dw3x3(x, params["b1_dw_w"], params["b1_dw_b"], 2)
        b1 = _ref_conv1x1(b1, params["b1_pw_w"], params["b1_pw_b"])
        b2 = _ref_conv1x1(x, params["b2_pw1_w"], params["b2_pw1_b"])
        b2 = _ref_dw3x3(b2, params["b2_dw_w"], params["b2_dw_b"], 2)
        b2 = _ref_conv1x1(b2, params["b2_pw2_w"], params["b2_pw2_b"])
        out = jnp.concatenate([b1, b2], axis=1)
    return _ref_channel_shuffle(out, 2)


if __name__ == "__main__":
    key = jax.random.PRNGKey(0)
    k_x, k_p1, k_p2 = jax.random.split(key, 3)

    # stride=1 block: input_c == output_c required by the module's assertion.
    N, C, H, W = 2, 16, 16, 16
    x = jax.random.normal(k_x, (N, C, H, W), jnp.float32)

    params1 = init_params(k_p1, input_c=C, output_c=C, stride=1)
    out1 = jax.block_until_ready(inverted_residual(params1, x))
    ref1 = _ref_forward(params1, x)
    assert out1.shape == (N, C, H, W)
    assert jnp.allclose(out1, ref1, rtol=2e-4, atol=2e-4)

    # stride=2 block: spatial downsample, output_c channels.
    params2 = init_params(k_p2, input_c=C, output_c=2 * C, stride=2)
    out2 = jax.block_until_ready(inverted_residual(params2, x))
    ref2 = _ref_forward(params2, x)
    assert out2.shape == (N, 2 * C, H // 2, W // 2)
    assert jnp.allclose(out2, ref2, rtol=2e-4, atol=2e-4)

    print("KERNEL_OK")
</pallas_src>

<mosaic_0001>
module attributes {stable_mosaic.version = 11 : i64} {
  func.func @_block_s1_kernel(%arg0: i32, %arg1: memref<1x16x256xf32, #tpu.memory_space<vmem>>, %arg2: memref<9x256xf32, #tpu.memory_space<vmem>>, %arg3: memref<8x8xf32, #tpu.memory_space<vmem>>, %arg4: memref<8x1xf32, #tpu.memory_space<vmem>>, %arg5: memref<8x9xf32, #tpu.memory_space<vmem>>, %arg6: memref<8x1xf32, #tpu.memory_space<vmem>>, %arg7: memref<16x8xf32, #tpu.memory_space<vmem>>, %arg8: memref<16x1xf32, #tpu.memory_space<vmem>>, %arg9: memref<16x8xf32, #tpu.memory_space<vmem>>, %arg10: memref<1x16x256xf32, #tpu.memory_space<vmem>>) attributes {dimension_semantics = [#tpu.dimension_semantics<parallel>], iteration_bounds = array<i64: 2>, scalar_prefetch = 0 : i64, scratch_operands = 0 : i64, tpu.core_type = #tpu.core_type<tc>, window_params = [{transform_indices = @transform_0, window_bounds = array<i64: 1, 16, 256>}, {pipeline_mode = #tpu.pipeline_mode<synchronous>, transform_indices = @transform_1, window_bounds = array<i64: 9, 256>}, {pipeline_mode = #tpu.pipeline_mode<synchronous>, transform_indices = @transform_2, window_bounds = array<i64: 8, 8>}, {pipeline_mode = #tpu.pipeline_mode<synchronous>, transform_indices = @transform_3, window_bounds = array<i64: 8, 1>}, {pipeline_mode = #tpu.pipeline_mode<synchronous>, transform_indices = @transform_4, window_bounds = array<i64: 8, 9>}, {pipeline_mode = #tpu.pipeline_mode<synchronous>, transform_indices = @transform_5, window_bounds = array<i64: 8, 1>}, {pipeline_mode = #tpu.pipeline_mode<synchronous>, transform_indices = @transform_6, window_bounds = array<i64: 16, 8>}, {pipeline_mode = #tpu.pipeline_mode<synchronous>, transform_indices = @transform_7, window_bounds = array<i64: 16, 1>}, {pipeline_mode = #tpu.pipeline_mode<synchronous>, transform_indices = @transform_8, window_bounds = array<i64: 16, 8>}, {transform_indices = @transform_9, window_bounds = array<i64: 1, 16, 256>}]} {
    %c0 = arith.constant 0 : index
    %c0_0 = arith.constant 0 : index
    %c0_1 = arith.constant 0 : index
    %0 = vector.load %arg1[%c0, %c0_0, %c0_1] : memref<1x16x256xf32, #tpu.memory_space<vmem>>, vector<1x16x256xf32>
    %1 = vector.shape_cast %0 : vector<1x16x256xf32> to vector<16x256xf32>
    %2 = vector.extract_strided_slice %1 {offsets = [0, 0], sizes = [8, 256], strides = [1, 1]} : vector<16x256xf32> to vector<8x256xf32>
    %3 = vector.extract_strided_slice %1 {offsets = [8, 0], sizes = [8, 256], strides = [1, 1]} : vector<16x256xf32> to vector<8x256xf32>
    %c0_2 = arith.constant 0 : index
    %c0_3 = arith.constant 0 : index
    %4 = vector.load %arg3[%c0_2, %c0_3] : memref<8x8xf32, #tpu.memory_space<vmem>>, vector<8x8xf32>
    %cst = arith.constant dense<0.000000e+00> : vector<8x256xf32>
    %5 = tpu.matmul %4, %3, %cst {dimension_numbers = #tpu.dot_dimension_numbers<[1], [0], [0], [1], [0, 0, 1, 1], [], []>} : vector<8x8xf32>, vector<8x256xf32>, vector<8x256xf32> -> vector<8x256xf32>
    %c0_4 = arith.constant 0 : index
    %c0_5 = arith.constant 0 : index
    %6 = vector.load %arg4[%c0_4, %c0_5] : memref<8x1xf32, #tpu.memory_space<vmem>>, vector<8x1xf32>
    %7 = vector.broadcast %6 : vector<8x1xf32> to vector<8x256xf32>
    %8 = arith.addf %5, %7 : vector<8x256xf32>
    %cst_6 = arith.constant 0.000000e+00 : f32
    %9 = vector.broadcast %cst_6 : f32 to vector<8x256xf32>
    %10 = arith.maximumf %8, %9 : vector<8x256xf32>
    %c0_7 = arith.constant 0 : index
    %c0_8 = arith.constant 0 : index
    %11 = vector.load %arg6[%c0_7, %c0_8] : memref<8x1xf32, #tpu.memory_space<vmem>>, vector<8x1xf32>
    %cst_9 = arith.constant 0.000000e+00 : f32
    %12 = vector.broadcast %cst_9 : f32 to vector<8x256xf32>
    %13 = vector.broadcast %11 : vector<8x1xf32> to vector<8x256xf32>
    %14 = arith.addf %13, %12 : vector<8x256xf32>
    %cst_10 = arith.constant 0.000000e+00 : f32
    %15 = vector.broadcast %cst_10 : f32 to vector<8x17xf32>
    %16 = vector.extract_strided_slice %10 {offsets = [0, 0], sizes = [8, 239], strides = [1, 1]} : vector<8x256xf32> to vector<8x239xf32>
    %17 = tpu.concatenate %15, %16 in 1 : vector<8x17xf32>, vector<8x239xf32> -> vector<8x256xf32>
    %c0_11 = arith.constant 0 : index
    %c0_12 = arith.constant 0 : index
    %18 = vector.load %arg2[%c0_11, %c0_12] : memref<9x256xf32, #tpu.memory_space<vmem>>, vector<1x256xf32>
    %19 = vector.broadcast %18 : vector<1x256xf32> to vector<8x256xf32>
    %20 = arith.mulf %17, %19 : vector<8x256xf32>
    %c0_13 = arith.constant 0 : index
    %c0_14 = arith.constant 0 : index
    %21 = vector.load %arg5[%c0_13, %c0_14] : memref<8x9xf32, #tpu.memory_space<vmem>>, vector<8x1xf32>
    %22 = vector.broadcast %21 : vector<8x1xf32> to vector<8x256xf32>
    %23 = arith.mulf %20, %22 : vector<8x256xf32>
    %24 = arith.addf %14, %23 : vector<8x256xf32>
    %cst_15 = arith.constant 0.000000e+00 : f32
    %25 = vector.broadcast %cst_15 : f32 to vector<8x16xf32>
    %26 = vector.extract_strided_slice %10 {offsets = [0, 0], sizes = [8, 240], strides = [1, 1]} : vector<8x256xf32> to vector<8x240xf32>
    %27 = tpu.concatenate %25, %26 in 1 : vector<8x16xf32>, vector<8x240xf32> -> vector<8x256xf32>
    %c1 = arith.constant 1 : index
    %c0_16 = arith.constant 0 : index
    %28 = vector.load %arg2[%c1, %c0_16] : memref<9x256xf32, #tpu.memory_space<vmem>>, vector<1x256xf32>
    %29 = vector.broadcast %28 : vector<1x256xf32> to vector<8x256xf32>
    %30 = arith.mulf %27, %29 : vector<8x256xf32>
    %c0_17 = arith.constant 0 : index
    %c1_18 = arith.constant 1 : index
    %31 = vector.load %arg5[%c0_17, %c1_18] : memref<8x9xf32, #tpu.memory_space<vmem>>, vector<8x1xf32>
    %32 = vector.broadcast %31 : vector<8x1xf32> to vector<8x256xf32>
    %33 = arith.mulf %30, %32 : vector<8x256xf32>
    %34 = arith.addf %24, %33 : vector<8x256xf32>
    %cst_19 = arith.constant 0.000000e+00 : f32
    %35 = vector.broadcast %cst_19 : f32 to vector<8x15xf32>
    %36 = vector.extract_strided_slice %10 {offsets = [0, 0], sizes = [8, 241], strides = [1, 1]} : vector<8x256xf32> to vector<8x241xf32>
    %37 = tpu.concatenate %35, %36 in 1 : vector<8x15xf32>, vector<8x241xf32> -> vector<8x256xf32>
    %c2 = arith.constant 2 : index
    %c0_20 = arith.constant 0 : index
    %38 = vector.load %arg2[%c2, %c0_20] : memref<9x256xf32, #tpu.memory_space<vmem>>, vector<1x256xf32>
    %39 = vector.broadcast %38 : vector<1x256xf32> to vector<8x256xf32>
    %40 = arith.mulf %37, %39 : vector<8x256xf32>
    %c0_21 = arith.constant 0 : index
    %c2_22 = arith.constant 2 : index
    %41 = vector.load %arg5[%c0_21, %c2_22] : memref<8x9xf32, #tpu.memory_space<vmem>>, vector<8x1xf32>
    %42 = vector.broadcast %41 : vector<8x1xf32> to vector<8x256xf32>
    %43 = arith.mulf %40, %42 : vector<8x256xf32>
    %44 = arith.addf %34, %43 : vector<8x256xf32>
    %cst_23 = arith.constant 0.000000e+00 : f32
    %45 = vector.broadcast %cst_23 : f32 to vector<8x1xf32>
    %46 = vector.extract_strided_slice %10 {offsets = [0, 0], sizes = [8, 255], strides = [1, 1]} : vector<8x256xf32> to vector<8x255xf32>
    %47 = tpu.concatenate %45, %46 in 1 : vector<8x1xf32>, vector<8x255xf32> -> vector<8x256xf32>
    %c3 = arith.constant 3 : index
    %c0_24 = arith.constant 0 : index
    %48 = vector.load %arg2[%c3, %c0_24] : memref<9x256xf32, #tpu.memory_space<vmem>>, vector<1x256xf32>
    %49 = vector.broadcast %48 : vector<1x256xf32> to vector<8x256xf32>
    %50 = arith.mulf %47, %49 : vector<8x256xf32>
    %c0_25 = arith.constant 0 : index
    %c3_26 = arith.constant 3 : index
    %51 = vector.load %arg5[%c0_25, %c3_26] : memref<8x9xf32, #tpu.memory_space<vmem>>, vector<8x1xf32>
    %52 = vector.broadcast %51 : vector<8x1xf32> to vector<8x256xf32>
    %53 = arith.mulf %50, %52 : vector<8x256xf32>
    %54 = arith.addf %44, %53 : vector<8x256xf32>
    %c4 = arith.constant 4 : index
    %c0_27 = arith.constant 0 : index
    %55 = vector.load %arg2[%c4, %c0_27] : memref<9x256xf32, #tpu.memory_space<vmem>>, vector<1x256xf32>
    %56 = vector.broadcast %55 : vector<1x256xf32> to vector<8x256xf32>
    %57 = arith.mulf %10, %56 : vector<8x256xf32>
    %c0_28 = arith.constant 0 : index
    %c4_29 = arith.constant 4 : index
    %58 = vector.load %arg5[%c0_28, %c4_29] : memref<8x9xf32, #tpu.memory_space<vmem>>, vector<8x1xf32>
    %59 = vector.broadcast %58 : vector<8x1xf32> to vector<8x256xf32>
    %60 = arith.mulf %57, %59 : vector<8x256xf32>
    %61 = arith.addf %54, %60 : vector<8x256xf32>
    %cst_30 = arith.constant 0.000000e+00 : f32
    %62 = vector.broadcast %cst_30 : f32 to vector<8x1xf32>
    %63 = vector.extract_strided_slice %10 {offsets = [0, 1], sizes = [8, 255], strides = [1, 1]} : vector<8x256xf32> to vector<8x255xf32>
    %64 = tpu.concatenate %63, %62 in 1 : vector<8x255xf32>, vector<8x1xf32> -> vector<8x256xf32>
    %c5 = arith.constant 5 : index
    %c0_31 = arith.constant 0 : index
    %65 = vector.load %arg2[%c5, %c0_31] : memref<9x256xf32, #tpu.memory_space<vmem>>, vector<1x256xf32>
    %66 = vector.broadcast %65 : vector<1x256xf32> to vector<8x256xf32>
    %67 = arith.mulf %64, %66 : vector<8x256xf32>
    %c0_32 = arith.constant 0 : index
    %c5_33 = arith.constant 5 : index
    %68 = vector.load %arg5[%c0_32, %c5_33] : memref<8x9xf32, #tpu.memory_space<vmem>>, vector<8x1xf32>
    %69 = vector.broadcast %68 : vector<8x1xf32> to vector<8x256xf32>
    %70 = arith.mulf %67, %69 : vector<8x256xf32>
    %71 = arith.addf %61, %70 : vector<8x256xf32>
    %cst_34 = arith.constant 0.000000e+00 : f32
    %72 = vector.broadcast %cst_34 : f32 to vector<8x15xf32>
    %73 = vector.extract_strided_slice %10 {offsets = [0, 15], sizes = [8, 241], strides = [1, 1]} : vector<8x256xf32> to vector<8x241xf32>
    %74 = tpu.concatenate %73, %72 in 1 : vector<8x241xf32>, vector<8x15xf32> -> vector<8x256xf32>
    %c6 = arith.constant 6 : index
    %c0_35 = arith.constant 0 : index
    %75 = vector.load %arg2[%c6, %c0_35] : memref<9x256xf32, #tpu.memory_space<vmem>>, vector<1x256xf32>
    %76 = vector.broadcast %75 : vector<1x256xf32> to vector<8x256xf32>
    %77 = arith.mulf %74, %76 : vector<8x256xf32>
    %c0_36 = arith.constant 0 : index
    %c6_37 = arith.constant 6 : index
    %78 = vector.load %arg5[%c0_36, %c6_37] : memref<8x9xf32, #tpu.memory_space<vmem>>, vector<8x1xf32>
    %79 = vector.broadcast %78 : vector<8x1xf32> to vector<8x256xf32>
    %80 = arith.mulf %77, %79 : vector<8x256xf32>
    %81 = arith.addf %71, %80 : vector<8x256xf32>
    %cst_38 = arith.constant 0.000000e+00 : f32
    %82 = vector.broadcast %cst_38 : f32 to vector<8x16xf32>
    %83 = vector.extract_strided_slice %10 {offsets = [0, 16], sizes = [8, 240], strides = [1, 1]} : vector<8x256xf32> to vector<8x240xf32>
    %84 = tpu.concatenate %83, %82 in 1 : vector<8x240xf32>, vector<8x16xf32> -> vector<8x256xf32>
    %c7 = arith.constant 7 : index
    %c0_39 = arith.constant 0 : index
    %85 = vector.load %arg2[%c7, %c0_39] : memref<9x256xf32, #tpu.memory_space<vmem>>, vector<1x256xf32>
    %86 = vector.broadcast %85 : vector<1x256xf32> to vector<8x256xf32>
    %87 = arith.mulf %84, %86 : vector<8x256xf32>
    %c0_40 = arith.constant 0 : index
    %c7_41 = arith.constant 7 : index
    %88 = vector.load %arg5[%c0_40, %c7_41] : memref<8x9xf32, #tpu.memory_space<vmem>>, vector<8x1xf32>
    %89 = vector.broadcast %88 : vector<8x1xf32> to vector<8x256xf32>
    %90 = arith.mulf %87, %89 : vector<8x256xf32>
    %91 = arith.addf %81, %90 : vector<8x256xf32>
    %cst_42 = arith.constant 0.000000e+00 : f32
    %92 = vector.broadcast %cst_42 : f32 to vector<8x17xf32>
    %93 = vector.extract_strided_slice %10 {offsets = [0, 17], sizes = [8, 239], strides = [1, 1]} : vector<8x256xf32> to vector<8x239xf32>
    %94 = tpu.concatenate %93, %92 in 1 : vector<8x239xf32>, vector<8x17xf32> -> vector<8x256xf32>
    %c8 = arith.constant 8 : index
    %c0_43 = arith.constant 0 : index
    %95 = vector.load %arg2[%c8, %c0_43] : memref<9x256xf32, #tpu.memory_space<vmem>>, vector<1x256xf32>
    %96 = vector.broadcast %95 : vector<1x256xf32> to vector<8x256xf32>
    %97 = arith.mulf %94, %96 : vector<8x256xf32>
    %c0_44 = arith.constant 0 : index
    %c8_45 = arith.constant 8 : index
    %98 = vector.load %arg5[%c0_44, %c8_45] : memref<8x9xf32, #tpu.memory_space<vmem>>, vector<8x1xf32>
    %99 = vector.broadcast %98 : vector<8x1xf32> to vector<8x256xf32>
    %100 = arith.mulf %97, %99 : vector<8x256xf32>
    %101 = arith.addf %91, %100 : vector<8x256xf32>
    %c0_46 = arith.constant 0 : index
    %c0_47 = arith.constant 0 : index
    %102 = vector.load %arg7[%c0_46, %c0_47] : memref<16x8xf32, #tpu.memory_space<vmem>>, vector<16x8xf32>
    %cst_48 = arith.constant dense<0.000000e+00> : vector<16x256xf32>
    %103 = tpu.matmul %102, %101, %cst_48 {dimension_numbers = #tpu.dot_dimension_numbers<[1], [0], [0], [1], [0, 0, 1, 1], [], []>} : vector<16x8xf32>, vector<8x256xf32>, vector<16x256xf32> -> vector<16x256xf32>
    %c0_49 = arith.constant 0 : index
    %c0_50 = arith.constant 0 : index
    %104 = vector.load %arg8[%c0_49, %c0_50] : memref<16x1xf32, #tpu.memory_space<vmem>>, vector<16x1xf32>
    %105 = vector.broadcast %104 : vector<16x1xf32> to vector<16x256xf32>
    %106 = arith.addf %103, %105 : vector<16x256xf32>
    %cst_51 = arith.constant 0.000000e+00 : f32
    %107 = vector.broadcast %cst_51 : f32 to vector<16x256xf32>
    %108 = arith.maximumf %106, %107 : vector<16x256xf32>
    %c0_52 = arith.constant 0 : index
    %c0_53 = arith.constant 0 : index
    %109 = vector.load %arg9[%c0_52, %c0_53] : memref<16x8xf32, #tpu.memory_space<vmem>>, vector<16x8xf32>
    %cst_54 = arith.constant dense<0.000000e+00> : vector<16x256xf32>
    %110 = tpu.matmul %109, %2, %cst_54 {dimension_numbers = #tpu.dot_dimension_numbers<[1], [0], [0], [1], [0, 0, 1, 1], [], []>} : vector<16x8xf32>, vector<8x256xf32>, vector<16x256xf32> -> vector<16x256xf32>
    %111 = arith.addf %108, %110 : vector<16x256xf32>
    %c0_55 = arith.constant 0 : index
    %c0_56 = arith.constant 0 : index
    %c0_57 = arith.constant 0 : index
    %112 = vector.load %arg10[%c0_55, %c0_56, %c0_57] : memref<1x16x256xf32, #tpu.memory_space<vmem>>, vector<1x16x256xf32>
    %113 = vector.shape_cast %112 : vector<1x16x256xf32> to vector<16x256xf32>
    %114 = vector.shape_cast %111 : vector<16x256xf32> to vector<1x16x256xf32>
    tpu.vector_store %arg10[%c0_55, %c0_56, %c0_57], %114 {strides = array<i32>} : memref<1x16x256xf32, #tpu.memory_space<vmem>>, vector<1x16x256xf32>,
    return
  }
  func.func @transform_0(%arg0: i32) -> (i32, i32, i32) {
    %c0_i32 = arith.constant 0 : i32
    %c0_i32_0 = arith.constant 0 : i32
    %c0_i32_1 = arith.constant 0 : i32
    return %arg0, %c0_i32, %c0_i32_0 : i32, i32, i32
  }
  func.func @transform_1(%arg0: i32) -> (i32, i32) {
    %c0_i32 = arith.constant 0 : i32
    %c0_i32_0 = arith.constant 0 : i32
    %c0_i32_1 = arith.constant 0 : i32
    return %c0_i32, %c0_i32_0 : i32, i32
  }
  func.func @transform_2(%arg0: i32) -> (i32, i32) {
    %c0_i32 = arith.constant 0 : i32
    %c0_i32_0 = arith.constant 0 : i32
    %c0_i32_1 = arith.constant 0 : i32
    return %c0_i32, %c0_i32_0 : i32, i32
  }
  func.func @transform_3(%arg0: i32) -> (i32, i32) {
    %c0_i32 = arith.constant 0 : i32
    %c0_i32_0 = arith.constant 0 : i32
    %c0_i32_1 = arith.constant 0 : i32
    return %c0_i32, %c0_i32_0 : i32, i32
  }
  func.func @transform_4(%arg0: i32) -> (i32, i32) {
    %c0_i32 = arith.constant 0 : i32
    %c0_i32_0 = arith.constant 0 : i32
    %c0_i32_1 = arith.constant 0 : i32
    return %c0_i32, %c0_i32_0 : i32, i32
  }
  func.func @transform_5(%arg0: i32) -> (i32, i32) {
    %c0_i32 = arith.constant 0 : i32
    %c0_i32_0 = arith.constant 0 : i32
    %c0_i32_1 = arith.constant 0 : i32
    return %c0_i32, %c0_i32_0 : i32, i32
  }
  func.func @transform_6(%arg0: i32) -> (i32, i32) {
    %c0_i32 = arith.constant 0 : i32
    %c0_i32_0 = arith.constant 0 : i32
    %c0_i32_1 = arith.constant 0 : i32
    return %c0_i32, %c0_i32_0 : i32, i32
  }
  func.func @transform_7(%arg0: i32) -> (i32, i32) {
    %c0_i32 = arith.constant 0 : i32
    %c0_i32_0 = arith.constant 0 : i32
    %c0_i32_1 = arith.constant 0 : i32
    return %c0_i32, %c0_i32_0 : i32, i32
  }
  func.func @transform_8(%arg0: i32) -> (i32, i32) {
    %c0_i32 = arith.constant 0 : i32
    %c0_i32_0 = arith.constant 0 : i32
    %c0_i32_1 = arith.constant 0 : i32
    return %c0_i32, %c0_i32_0 : i32, i32
  }
  func.func @transform_9(%arg0: i32) -> (i32, i32, i32) {
    %c0_i32 = arith.constant 0 : i32
    %c0_i32_0 = arith.constant 0 : i32
    %c0_i32_1 = arith.constant 0 : i32
    return %arg0, %c0_i32, %c0_i32_0 : i32, i32, i32
  }
}

</mosaic_0001>

<bundles_post_ra>
// kernel: tpu_custom_call.1
= control target key start
LH: loop header
LB: loop body
LE: loop exit
PB: predicated region body
PF: predicated region fallthrough
CT: control target
= control target key end

     0   :  { %14 = vsyncpa [#allocation3], 0  ;;  %s1419_s0 = inlined_call_operand.hbm [shape: f32[2,16,256], index: 0, kind: input, shape index: {}]   ;;  %s1420_s1 = inlined_call_operand.vmem [shape: f32[9,256], index: 1, kind: input, shape index: {}]   ;;  %s1421_s2 = inlined_call_operand.vmem [shape: f32[8,8], index: 2, kind: input, shape index: {}]   ;;  %s1422_s3 = inlined_call_operand.vmem [shape: f32[8,1], index: 3, kind: input, shape index: {}]   ;;  %s1423_s4 = inlined_call_operand.vmem [shape: f32[8,9], index: 4, kind: input, shape index: {}]   ;;  %s1424_s5 = inlined_call_operand.vmem [shape: f32[8,1], index: 5, kind: input, shape index: {}]   ;;  %s1425_s6 = inlined_call_operand.vmem [shape: f32[16,8], index: 6, kind: input, shape index: {}]   ;;  %s1426_s7 = inlined_call_operand.vmem [shape: f32[16,1], index: 7, kind: input, shape index: {}]   ;;  %s1427_s8 = inlined_call_operand.vmem [shape: f32[16,8], index: 8, kind: input, shape index: {}]   ;;  %s1428_s9 = inlined_call_operand.hbm [shape: f32[2,16,256], index: 9, kind: output, shape index: {}]  }
   0x1   :  { %16 = vsyncpa [#allocation3 + $0x1], 0 }
   0x2   :  { %17 = vsyncpa [#allocation4], 0 }
   0x3   :  { %19 = vsyncpa [#allocation4 + $0x1], 0  ;;  %s1147_s30 = smov 0   ;;  %s1149_s10 = smov 0  }
   0x4   :  { %s1151_s11 = smov 0   ;;  %s1153_s12 = smov 0  }
   0x5 LB: > { %1432 = sst [smem:[#allocation8_spill]] %s1071_s11  ;;  %s1168_s13 = sadd.s32 4294967295, %s1075_s12   ;;  %s1075_s12 = sphi %s1153_s12, %s1441_s12   ;;  %s1071_s11 = sphi %s1151_s11, %s1443_s11   ;;  %s1067_s10 = sphi %s1149_s10, %s1445_s10   ;;  %s1063_s30 = sphi %s1147_s30, %s1444_s30  }
   0x6   : > { %s866_s14 = sadd.s32 4294967294, %s1075_s12   ;;  %s1172_s15 = sadd.s32 1, %s1075_s12  }
   0x7   : > { %1433 = sst [smem:[#allocation9_spill]] %s1172_s15  ;;  %s32_s16 = sadd.s32 1, %s1071_s11 }
   0x8   : > { %s29_s17 = ssub.s32 %s1075_s12, %s1172_s15  ;;  %p39_p0 = scmp.ne.s32.totalorder %s1071_s11, %s1067_s10 }
   0x9   : > { %p30_p1 = scmp.eq.s32.totalorder %s29_s17, 0  ;;  %p40_p2 = scmp.eq.s32.totalorder %s1075_s12, 0 }
   0xa   : > { %p45_p3 = scmp.ne.s32.totalorder %s1067_s10, %s1063_s30  ;;  %p46_p4 = scmp.eq.s32.totalorder %s1168_s13, 0 }
   0xb   : > { %s1184_s18 = scalar_select %p30_p1, %s1071_s11, %s32_s16  }
   0xc   : > { %p1186_p5 = por %p40_p2, %p39_p0  ;;  %p1190_p6 = por %p46_p4, %p45_p3 }
   0xd   : > { %1434 = sst [smem:[#allocation10_spill]] %s1184_s18  ;;  %p237_p7 = scmp.eq.s32.totalorder %s1168_s13, 1 }
   0xe   : > { %p243_p8 = scmp.eq.s32.totalorder %s866_s14, 1  ;;  %p912_p10 = scmp.lt.s32.totalorder %s1075_s12, 2 }
   0xf   : > { %p1197_p11 = por %p237_p7, %p39_p0  ;;  %s287_s23 = sand.u32 1, %s1071_s11  }
  0x10   : > { %p1201_p12 = por %p243_p8, %p45_p3  ;;  %s898_s24 = sshll.u32 %s1075_s12, 5 }
  0x11   : > { %s869_s25 = sshll.u32 %s287_s23, 5  ;;  %s296_s28 = scalar_lea.hbm %s1419_s0, %s898_s24 }
  0x12   : > { %s297_s29 = sshll.u32 %s296_s28, 4  ;;  %s291_s14 = scalar_lea.vmem [#allocation2], %s869_s25  ;;  %s298_s29 = int_to_ptr.hbm [resolvable:$true] %s297_s29 }
  0x13   : > { %s299_s16 = sshll.u32 %s291_s14, 4  ;;  %p1212_p13 = pnand %p912_p10, %p1186_p5  ;;  %s300_s16 = int_to_ptr.vmem [resolvable:$true] %s299_s16 }
  0x14   : > { %p872_p0 = scmp.ge.s32.totalorder %s1075_s12, 1  ;;  %p307_p1 = scmp.lt.s32.totalorder %s1075_s12, 3 }
  0x15   : > { %s288_s18 = scalar_lea.sflag [#allocation3], %s287_s23  ;;  %s979_s11 = sshra.s32 %s298_s29, 4  ;;  %s980_s11 = int_to_ptr.hbm [resolvable:$true] %s979_s11 }
  0x16   : > { %s981_s15 = scalar_lea.hbm %s980_s11, 32  ;;  %p983_p3 = pneg %p1212_p13 }
  0x17   : > { %p982_p2 = scmp.ne.s32.totalorder %s980_s11, %s981_s15  ;;  %s986_s19 = scalar_lea.hbm %s1419_s0, 64 }
  0x18   : > { %p987_p5 = scmp.lt.s32.totalorder %s980_s11, %s1419_s0  ;;  %p988_p8 = scmp.lt.s32.totalorder %s986_s19, %s981_s15 }
  0x19   : > { %p984_p4 = pnand %p983_p3, %p982_p2 }
  0x1a   : > { %p989_p10 = por %p988_p8, %p987_p5 }
  0x1b   : > { %p985_p7 = pneg %p984_p4 }
  0x1d   : > { %p990_p9 = pnand %p989_p10, %p985_p7 }
  0x1f   : > { %993 = shalt.err (!%p990_p9)
}
  0x20   : > { %s1077_s23 = smov 256   ;;  %s1078_s28 = smov 16  }
  0x21   : > { %907 = dma.hbm_to_vmem [thread:$0]  (!%p1212_p13), %s298_s29, 512, %s300_s16, %s288_s18, %s1077_s23, %s1077_s23, %s1078_s28  }
  0x22   : > { %p308_p2 = pnand %p872_p0, %p307_p1 }
  0x23   : > { %s1233_s14 = sand.u32 (!%p308_p2), 1, %s1067_s10  }
  0x24   : > { %311 = sbr.rel (%p308_p2) target bundleno = 505 (0x1f9), region = 56  ;;  %s873_s11 = sshll.u32 (!%p308_p2), %s1233_s14, 5 }
  0x25   : > { %s314_s15 = scalar_lea.sflag (!%p308_p2), [#allocation3], %s1233_s14  ;;  %s1239_s24 = scalar_lea.vmem (!%p308_p2), [#allocation2], %s873_s11 }
  0x29   : > { %1054 = dma.done.wait (%p1190_p6), %s314_s15, 512  }
  0x2a   : > { %1056 = vsyncadd (%p1190_p6), %s314_s15, 4294966784  ;;  %v1079_v0 = vmov 0   ;;  %vm364_vm0 = vcmask 64512   ;;  %v355_v1 = vld [vmem:[%s1239_s24 + $0x10] sm:$0xff]  ;;  %v356_v2 = vld [vmem:[%s1239_s24 + $0x18] sm:$0xff]  ;;  %v1080_v7 = vmov 3  }
  0x2b   : > { %966 = vset.pattern.permute.xlu0 %v1079_v0  ;;  %967 = vset.pattern.permute.xlu2 %v1079_v0  ;;  %v357_v3 = vld [vmem:[%s1421_s2] sm:$0xff]  ;;  %v1081_v8 = vmov 4   ;;  %v1082_v9 = vmov 2   ;;  %v1083_v10 = vmov 5   ;;  %v1084_v11 = vmov 1   ;;  %s1085_s27 = smov 16  }
  0x2c   : > { %383 = vmatpush.msra.mxu0 %v355_v1  ;;  %403 = vmatpush.msra.mxu1 %v356_v2  ;;  %v358_v4 = vld [vmem:[%s1422_s3] sm:$0xff]  ;;  %s1086_s23 = smov 17   ;;  %s1087_s28 = smov 1   ;;  %v1091_v19 = vmov 6   ;;  %v1092_v20 = vmov 8   ;;  %v1094_v21 = vmov 7  }
  0x2d   : > { %v436_v5 = vld [vmem:[%s1423_s4] sm:$0xff]  ;;  %875 = vmatmul.msk.f32.vlgmr.msra.gmra.mxu0 %vm364_vm0, %v357_v3  ;;  %876 = vmatmul.msk.f32.vlgmr.msra.gmra.mxu1 %vm364_vm0, %v357_v3  ;;  %s1088_s15 = smov 15   ;;  %s1089_s18 = smov 127   ;;  %vm423_vm1 = vcmask 138240   ;;  %vm450_vm2 = vcmask 130048   ;;  %v354_v51 = vld [vmem:[%s1239_s24 + $0x8] sm:$0xff] }
  0x2e   : > { %361 = vperm.xlu0 %966, %v358_v4   ;;  %439 = vperm.xlu2 %967, %v436_v5   ;;  %v410_v6 = vld [vmem:[%s1424_s5] sm:$0xff]  ;;  %s1090_s29 = smov 113   ;;  %s1093_s16 = smov 112   ;;  %vm476_vm3 = vcmask 121856   ;;  %vm502_vm4 = vcmask 7168   ;;  %vm545_vm5 = vcmask 1039360  }
  0x2f   : > { %969 = vset.pattern.permute.xlu1 %v1082_v9  ;;  %s1095_s17 = smov 111   ;;  %v428_v37 = vld [vmem:[%s1420_s1] ss:$8 sm:$0x3]  ;;  %761 = vmatpush.msrb.mxu1 %v354_v51  ;;  %vm571_vm6 = vcmask 924672   ;;  %vm597_vm7 = vcmask 916480  }
  0x30   : > { %491 = vperm.xlu1 %969, %v436_v5   ;;  %v877_v38 = vld [vmem:[%s1420_s1 + $0x1] ss:$8 sm:$0x3]  ;;  %v430_v39 = vperm.slane %v428_v37, 0  ;;  %v431_v43 = vperm.slane %v428_v37, 1  ;;  %vm623_vm8 = vcmask 908288  }
  0x31   : > { %v458_v42 = vperm.slane %v877_v38, 0  ;;  %v880_v46 = vld [vmem:[%s1420_s1 + $0x4] ss:$8 sm:$0x3]  ;;  %v459_v49 = vperm.slane %v877_v38, 1 }
  0x32   : > { %v353_v50 = vld [vmem:[%s1239_s24] sm:$0xff]  ;;  %v527_v57 = vperm.slane %v880_v46, 0  ;;  %v528_v4 = vperm.slane %v880_v46, 1 }
  0x33   : > { %v878_v52 = vld [vmem:[%s1420_s1 + $0x2] ss:$8 sm:$0x3]  ;;  %v879_v53 = vld [vmem:[%s1420_s1 + $0x3] ss:$8 sm:$0x3]  ;;  %738 = vmatpush.msrb.mxu0 %v353_v50 }
  0x34   : > { %v485_v59 = vperm.slane %v878_v52, 1  ;;  %v484_v61 = vperm.slane %v878_v52, 0  ;;  %v510_v63 = vperm.slane %v879_v53, 0  ;;  %v511_v2 = vperm.slane %v879_v53, 1 }
  0x35   : > { %v883_v37 = vld [vmem:[%s1420_s1 + $0x7] ss:$8 sm:$0x3] }
  0x36   : > { %413 = vperm.xlu2 %967, %v410_v6   ;;  %968 = vset.pattern.permute.xlu0 %v1084_v11  ;;  %v606_v51 = vperm.slane %v883_v37, 1 }
  0x37   : > { %465 = vperm.xlu0 %968, %v436_v5  }
  0x38   : > { %976 = vset.pattern.permute.xlu1 %v1079_v0 }
  0x3e   : > { %970 = vset.pattern.permute.xlu2 %v1080_v7 }
  0x3f   : > { %517 = vperm.xlu2 %970, %v436_v5   ;;  %975 = vset.pattern.permute.xlu0 %v1092_v20 }
  0x47   : > { %971 = vset.pattern.permute.xlu2 %v1081_v8 }
  0x48   : > { %534 = vperm.xlu2 %971, %v436_v5  }
  0x50   : > { %972 = vset.pattern.permute.xlu2 %v1083_v10  ;;  %v881_v10 = vld [vmem:[%s1420_s1 + $0x5] ss:$8 sm:$0x3] }
  0x51   : > { %560 = vperm.xlu2 %972, %v436_v5  }
  0x59   : > { %973 = vset.pattern.permute.xlu2 %v1091_v19  ;;  %v647_v19 = vld [vmem:[%s1426_s7] sm:$0xff] }
  0x88   : > { %v440_v22 = vpop.permute.xlu2 %439 }
  0x90   : > { %v1288_v23 = vpop.permute.xlu2 %413 }
  0x99   : > { %v1294_v26 = vpop.permute.xlu2 %517 }
  0xa0   : > { %v362_v12 = vpop.permute.xlu0 %361 }
  0xa2   : > { %v1290_v24 = vpop.permute.xlu1 %491  ;;  %v1296_v29 = vpop.permute.xlu2 %534 }
  0xa9   : > { %v1292_v25 = vpop.permute.xlu0 %465 }
  0xaa   : > { %v385_v13 = vpop.f32.mrf.mxu0  ;;  %v405_v14 = vpop.f32.mrf.mxu1 }
  0xab   : > { %v386_v15 = vadd.f32 %v385_v13, %v362_v12  ;;  %v406_v16 = vadd.f32 %v405_v14, %v362_v12  ;;  %v1298_v32 = vpop.permute.xlu2 %560 }
  0xad   : > { %v1264_v17 = vmax.f32 %v386_v15, 0.0  ;;  %v1266_v18 = vmax.f32 %v406_v16, 0.0  ;;  %v882_v15 = vld [vmem:[%s1420_s1 + $0x6] ss:$8 sm:$0x3] }
  0xae   : > { %v715_v16 = vld [vmem:[%s1427_s8] sm:$0xff] }
  0xaf   : > { %448 = vrot.lane.b32.xlu2 %v1266_v18, %s1085_s27  ;;  %421 = vrot.lane.b32.xlu1 %v1266_v18, %s1086_s23  ;;  %v531_v20 = vmul.f32 %v527_v57, %v1264_v17 }
  0xb0   : > { %419 = vrot.lane.b32.xlu0 %v1264_v17, %s1086_s23  ;;  %889 = vmatmul.msk.f32.vlgmr.msrb.gmra.mxu0 %vm364_vm0, %v715_v16  ;;  %s1029_s23 = scalar_lea.hbm %s1428_s9, 64 }
  0xb1   : > { %891 = vmatmul.msk.f32.vlgmr.msrb.gmra.mxu1 %vm364_vm0, %v715_v16 }
  0xb7   : > { %500 = vrot.lane.b32.xlu2 %v1266_v18, %s1087_s28  ;;  %446 = vrot.lane.b32.xlu1 %v1264_v17, %s1085_s27 }
  0xb8   : > { %472 = vrot.lane.b32.xlu0 %v1264_v17, %s1088_s15 }
  0xbf   : > { %474 = vrot.lane.b32.xlu1 %v1266_v18, %s1088_s15  ;;  %586 = vperm.xlu2 %973, %v436_v5   ;;  %s899_s15 = sshll.u32 %s1168_s13, 5 }
  0xc0   : > { %541 = vrot.lane.b32.xlu0 %v1264_v17, %s1089_s18  ;;  %s789_s24 = scalar_lea.hbm %s1428_s9, %s899_s15 }
  0xc1   : > { %s792_s13 = sshll.u32 %s789_s24, 4  ;;  %s793_s13 = int_to_ptr.hbm [resolvable:$true] %s792_s13 }
  0xc2   : > { %s1023_s20 = sshra.s32 %s793_s13, 4  ;;  %s1024_s20 = int_to_ptr.hbm [resolvable:$true] %s1023_s20 }
  0xc3   : > { %s1025_s25 = scalar_lea.hbm %s1024_s20, 32  ;;  %p1030_p0 = scmp.lt.s32.totalorder %s1024_s20, %s1428_s9 }
  0xc4   : > { %p1026_p6 = scmp.ne.s32.totalorder %s1024_s20, %s1025_s25  ;;  %p1031_p1 = scmp.lt.s32.totalorder %s1029_s23, %s1025_s25 }
  0xc6   : > { %p1027_p9 = pnand %p1026_p6, %p1197_p11  ;;  %p1032_p3 = por %p1031_p1, %p1030_p0 }
  0xc7   : > { %498 = vrot.lane.b32.xlu1 %v1264_v17, %s1087_s28  ;;  %974 = vset.pattern.permute.xlu2 %v1094_v21 }
  0xc8   : > { %567 = vrot.lane.b32.xlu0 %v1264_v17, %s1090_s29  ;;  %612 = vperm.xlu2 %974, %v436_v5   ;;  %p1028_p13 = pneg %p1027_p9 }
  0xca   : > { %p1033_p4 = pnand %p1032_p3, %p1028_p13 }
  0xcf   : > { %543 = vrot.lane.b32.xlu1 %v1266_v18, %s1089_s18  ;;  %s352_s18 = scalar_lea.vmem [#allocation5], %s873_s11  ;;  %s778_s11 = scalar_lea.sflag [#allocation4], %s1233_s14 }
  0xd0   : > { %593 = vrot.lane.b32.xlu0 %v1264_v17, %s1093_s16  ;;  %977 = vset.pattern.permute.xlu2 %v1079_v0 }
  0xd7   : > { %569 = vrot.lane.b32.xlu1 %v1266_v18, %s1090_s29 }
  0xd8   : > { %619 = vrot.lane.b32.xlu0 %v1264_v17, %s1095_s17 }
  0xdf   : > { %595 = vrot.lane.b32.xlu1 %v1266_v18, %s1093_s16 }
  0xe0   : > { %638 = vperm.xlu0 %975, %v436_v5  }
  0xe7   : > { %621 = vrot.lane.b32.xlu1 %v1266_v18, %s1095_s17  ;;  %s790_s17 = sshll.u32 %s352_s18, 4  ;;  %s791_s17 = int_to_ptr.vmem [resolvable:$true] %s790_s17 }
  0xe8   : > { %978 = vset.pattern.permute.xlu0 %v1079_v0 }
  0xef   : > { %651 = vperm.xlu1 %976, %v647_v19  }
 0x109   : > { %v449_v36 = vpop.permute.xlu2 %448 }
 0x111   : > { %v501_v54 = vpop.permute.xlu2 %500 }
 0x121   : > { %v422_v27 = vpop.permute.xlu1 %421 }
 0x122   : > { %v420_v28 = vpop.permute.xlu0 %419 }
 0x123   : > { %v427_v41 = vsel %vm423_vm1, 0.0, %v420_v28  ;;  %v424_v47 = vsel %vm423_vm1, %v420_v28, %v422_v27  ;;  %v648_v27 = vld [vmem:[%s1426_s7 + $0x8] sm:$0xff]  ;;  %v532_v28 = vmul.f32 %v528_v4, %v1266_v18 }
 0x124   : > { %v434_v48 = vmul.f32 %v430_v39, %v427_v41  ;;  %v435_v58 = vmul.f32 %v431_v43, %v424_v47  ;;  %656 = vperm.xlu2 %977, %v648_v27   ;;  %v580_v43 = vperm.slane %v882_v15, 1 }
 0x126   : > { %v442_v60 = vmul.f32 %v440_v22, %v434_v48  ;;  %v443_v8 = vmul.f32 %v440_v22, %v435_v58  ;;  %v605_v48 = vperm.slane %v883_v37, 0  ;;  %v537_v58 = vmul.f32 %v1296_v29, %v531_v20 }
 0x128   : > { %v444_v12 = vadd.f32 %v442_v60, %v1288_v23  ;;  %v445_v17 = vadd.f32 %v443_v8, %v1288_v23 }
 0x129   : > { %v447_v30 = vpop.permute.xlu1 %446 }
 0x12a   : > { %v473_v31 = vpop.permute.xlu0 %472  ;;  %v454_v44 = vsel %vm450_vm2, 0.0, %v447_v30  ;;  %v451_v55 = vsel %vm450_vm2, %v447_v30, %v449_v36  ;;  %v579_v36 = vperm.slane %v882_v15, 0 }
 0x12b   : > { %v462_v56 = vmul.f32 %v458_v42, %v454_v44  ;;  %v463_v0 = vmul.f32 %v459_v49, %v451_v55  ;;  %v480_v1 = vsel %vm476_vm3, 0.0, %v473_v31 }
 0x12c   : > { %v488_v13 = vmul.f32 %v484_v61, %v480_v1 }
 0x12d   : > { %v468_v5 = vmul.f32 %v1292_v25, %v462_v56  ;;  %v469_v21 = vmul.f32 %v1292_v25, %v463_v0 }
 0x12e   : > { %v494_v38 = vmul.f32 %v1290_v24, %v488_v13 }
 0x12f   : > { %v470_v30 = vadd.f32 %v468_v5, %v444_v12  ;;  %v471_v23 = vadd.f32 %v469_v21, %v445_v17  ;;  %v763_v17 = vpop.f32.mrf.mxu1 }
 0x131   : > { %v475_v33 = vpop.permute.xlu1 %474  ;;  %v496_v44 = vadd.f32 %v494_v38, %v470_v30  ;;  %v645_v30 = vld [vmem:[%s1425_s6] sm:$0xff] }
 0x132   : > { %v1300_v34 = vpop.permute.xlu0 %541  ;;  %v477_v62 = vsel %vm476_vm3, %v473_v31, %v475_v33  ;;  %v553_v31 = vperm.slane %v881_v10, 0  ;;  %v554_v33 = vperm.slane %v881_v10, 1 }
 0x133   : > { %v489_v9 = vmul.f32 %v485_v59, %v477_v62  ;;  %v538_v59 = vmul.f32 %v1296_v29, %v532_v28 }
 0x135   : > { %v495_v25 = vmul.f32 %v1290_v24, %v489_v9  ;;  %v716_v24 = vld [vmem:[%s1427_s8 + $0x8] sm:$0xff] }
 0x136   : > { %890 = vmatmul.msk.f32.gmra.mxu0 %vm364_vm0, %v716_v24  ;;  %892 = vmatmul.msk.f32.gmra.mxu1 %vm364_vm0, %v716_v24 }
 0x137   : > { %v497_v49 = vadd.f32 %v495_v25, %v471_v23 }
 0x139   : > { %v499_v35 = vpop.permute.xlu1 %498 }
 0x13a   : > { %v1308_v40 = vpop.permute.xlu0 %567  ;;  %v506_v3 = vsel %vm502_vm4, 0.0, %v499_v35  ;;  %v503_v6 = vsel %vm502_vm4, %v499_v35, %v501_v54  ;;  %v587_v35 = vpop.permute.xlu2 %586 }
 0x13b   : > { %v514_v14 = vmul.f32 %v510_v63, %v506_v3  ;;  %v515_v22 = vmul.f32 %v511_v2, %v503_v6 }
 0x13d   : > { %v520_v18 = vmul.f32 %v1294_v26, %v514_v14  ;;  %v521_v42 = vmul.f32 %v1294_v26, %v515_v22 }
 0x13f   : > { %v523_v55 = vadd.f32 %v521_v42, %v497_v49 }
 0x141   : > { %v1311_v45 = vpop.permute.xlu1 %543  ;;  %v540_v4 = vadd.f32 %v538_v59, %v523_v55 }
 0x142   : > { %v594_v7 = vpop.permute.xlu0 %593  ;;  %v546_v39 = vsel %vm545_vm5, %v1300_v34, %v1311_v45  ;;  %v549_v41 = vsel %vm545_vm5, %v1311_v45, 0.0  ;;  %v522_v45 = vadd.f32 %v520_v18, %v496_v44  ;;  %v613_v0 = vpop.permute.xlu2 %612 }
 0x143   : > { %v557_v50 = vmul.f32 %v553_v31, %v546_v39  ;;  %v558_v34 = vmul.f32 %v554_v33, %v549_v41  ;;  %v646_v31 = vld [vmem:[%s1425_s6 + $0x8] sm:$0xff] }
 0x144   : > { %v539_v3 = vadd.f32 %v537_v58, %v522_v45 }
 0x145   : > { %v563_v60 = vmul.f32 %v1298_v32, %v557_v50  ;;  %v564_v61 = vmul.f32 %v1298_v32, %v558_v34 }
 0x147   : > { %v566_v8 = vadd.f32 %v564_v61, %v540_v4 }
 0x149   : > { %v570_v11 = vpop.permute.xlu1 %569 }
 0x14a   : > { %v572_v46 = vsel %vm571_vm6, %v1308_v40, %v570_v11  ;;  %v575_v47 = vsel %vm571_vm6, %v570_v11, 0.0  ;;  %v620_v53 = vpop.permute.xlu0 %619  ;;  %v884_v40 = vld [vmem:[%s1420_s1 + $0x10] ss:$8 sm:$0x3] }
 0x14b   : > { %v583_v56 = vmul.f32 %v579_v36, %v572_v46  ;;  %v584_v57 = vmul.f32 %v580_v43, %v575_v47  ;;  %v631_v1 = vperm.slane %v884_v40, 0  ;;  %v632_v2 = vperm.slane %v884_v40, 1 }
 0x14d   : > { %v589_v5 = vmul.f32 %v587_v35, %v583_v56  ;;  %v590_v6 = vmul.f32 %v587_v35, %v584_v57  ;;  %v740_v35 = vpop.f32.mrf.mxu0 }
 0x14f   : > { %v592_v32 = vadd.f32 %v590_v6, %v566_v8 }
 0x151   : > { %v596_v52 = vpop.permute.xlu1 %595 }
 0x152   : > { %v598_v54 = vsel %vm597_vm7, %v594_v7, %v596_v52  ;;  %v601_v26 = vsel %vm597_vm7, %v596_v52, 0.0  ;;  %v565_v7 = vadd.f32 %v563_v60, %v539_v3  ;;  %v639_v13 = vpop.permute.xlu0 %638 }
 0x153   : > { %v609_v62 = vmul.f32 %v605_v48, %v598_v54  ;;  %v610_v63 = vmul.f32 %v606_v51, %v601_v26 }
 0x154   : > { %v591_v14 = vadd.f32 %v589_v5, %v565_v7 }
 0x155   : > { %v615_v9 = vmul.f32 %v613_v0, %v609_v62  ;;  %v616_v10 = vmul.f32 %v613_v0, %v610_v63 }
 0x157   : > { %v617_v21 = vadd.f32 %v615_v9, %v591_v14  ;;  %v618_v22 = vadd.f32 %v616_v10, %v592_v32 }
 0x159   : > { %v622_v11 = vpop.permute.xlu1 %621 }
 0x15a   : > { %v624_v29 = vsel %vm623_vm8, %v620_v53, %v622_v11  ;;  %v627_v12 = vsel %vm623_vm8, %v622_v11, 0.0 }
 0x15b   : > { %v635_v15 = vmul.f32 %v631_v1, %v624_v29  ;;  %v636_v16 = vmul.f32 %v632_v2, %v627_v12 }
 0x15d   : > { %v641_v19 = vmul.f32 %v639_v13, %v635_v15  ;;  %v642_v20 = vmul.f32 %v639_v13, %v636_v16 }
 0x15f   : > { %v643_v27 = vadd.f32 %v641_v19, %v617_v21  ;;  %v644_v28 = vadd.f32 %v642_v20, %v618_v22 }
 0x161   : > { %680 = vmatpush.msra.mxu2 %v643_v27  ;;  %703 = vmatpush.msra.mxu3 %v644_v28  ;;  %v652_v33 = vpop.permute.xlu1 %651 }
 0x162   : > { %885 = vmatmul.msk.f32.vlgmr.msra.gmra.mxu2 %vm364_vm0, %v645_v30  ;;  %887 = vmatmul.msk.f32.vlgmr.msra.gmra.mxu3 %vm364_vm0, %v645_v30 }
 0x16a   : > { %886 = vmatmul.msk.f32.gmra.mxu2 %vm364_vm0, %v646_v31  ;;  %888 = vmatmul.msk.f32.gmra.mxu3 %vm364_vm0, %v646_v31 }
 0x17e   : > { %v657_v42 = vpop.permute.xlu2 %656 }
 0x1b3   : > { %v743_v48 = vpop.f32.mrf.mxu0  ;;  %v766_v24 = vpop.f32.mrf.mxu1 }
 0x1e5   : > { %v682_v25 = vpop.f32.mrf.mxu2  ;;  %v705_v36 = vpop.f32.mrf.mxu3 }
 0x1e6   : > { %v683_v37 = vadd.f32 %v682_v25, %v652_v33  ;;  %v706_v38 = vadd.f32 %v705_v36, %v652_v33 }
 0x1e8   : > { %v711_v18 = vmax.f32 %v683_v37, 0.0  ;;  %v712_v39 = vmax.f32 %v706_v38, 0.0 }
 0x1ea   : > { %v769_v41 = vadd.f32 %v740_v35, %v711_v18  ;;  %v770_v23 = vadd.f32 %v763_v17, %v712_v39 }
 0x1ec   : > { %773 = vst [vmem:[%s352_s18] sm:$0xff] %v769_v41 }
 0x1ed   : > { %774 = vst [vmem:[%s352_s18 + $0x8] sm:$0xff] %v770_v23  ;;  %v685_v43 = vpop.f32.mrf.mxu2  ;;  %v708_v44 = vpop.f32.mrf.mxu3 }
 0x1ee   : > { %v686_v46 = vadd.f32 %v685_v43, %v657_v42  ;;  %v709_v47 = vadd.f32 %v708_v44, %v657_v42 }
 0x1f0   : > { %v713_v49 = vmax.f32 %v686_v46, 0.0  ;;  %v714_v50 = vmax.f32 %v709_v47, 0.0 }
 0x1f2   : > { %v771_v34 = vadd.f32 %v743_v48, %v713_v49  ;;  %v772_v51 = vadd.f32 %v766_v24, %v714_v50 }
 0x1f4   : > { %775 = vst [vmem:[%s352_s18 + $0x10] sm:$0xff] %v771_v34 }
 0x1f5   : > { %776 = vst [vmem:[%s352_s18 + $0x18] sm:$0xff] %v772_v51 }
 0x1f6   : > { %1036 = shalt.err (!%p1033_p4)
}
 0x1f7   : > { %s1096_s14 = smov 256  }
 0x1f8   : > { %902 = dma.vmem_to_hbm [thread:$0]  (%p1197_p11), %s791_s17, 512, %s793_s13, %s778_s11, %s1096_s14, %s1096_s14, %s1085_s27  }
 0x1f9 PF: > { %s807_s18 = sand.u32 1, %s1063_s30   ;;  %p1440_p7 = scmp.ge.s32.totalorder %s1075_s12, 2 }
 0x1fa   : > { %s808_s29 = scalar_lea.sflag [#allocation4], %s807_s18 }
 0x1fb   : > { %p909_p5 = pnand %p1440_p7, %p1201_p12 }
 0x1fd   : > { %p910_p8 = pneg %p909_p5 }
 0x1ff   : > { %1058 = dma.done.wait (%p910_p8), %s808_s29, 512  }
 0x200   : > { %1060 = vsyncadd (%p910_p8), %s808_s29, 4294966784  ;;  %s1441_s12 = sld [smem:[#allocation9_spill]]  ;;  %s1444_s30 = smov %s1067_s10 }
 0x201   : > { %s1442_s16 = sld [smem:[#allocation8_spill]] }
 0x202   : > { %s1443_s11 = sld [smem:[#allocation10_spill]] }
 0x206   : > { %p22_p10 = scmp.ge.s32.totalorder %s1441_s12, 4  }
 0x207   : > { %s1445_s10 = smov %s1442_s16 }
 0x208   :  { %24 = sbr.rel (!%p22_p10) target bundleno = 5 (0x5), region = 109 }
 0x20d   :  { %814 = vsyncpa [#allocation3], 1 }
 0x20e   :  { %816 = vsyncpa [#allocation3 + $0x1], 1 }
 0x20f   :  { %817 = vsyncpa [#allocation4], 1 }
 0x210   :  { %819 = vsyncpa [#allocation4 + $0x1], 1 }

</bundles_post_ra>
